<compile_context>
chip_gen: v5e
topology: v5e:2x2
jax: 0.10.0
libtpu: 0.0.40
codegen_flags: <defaults>
</compile_context>

<pallas_src>
import functools

import jax
import jax.numpy as jnp
from jax import lax
from jax.experimental import pallas as pl
from jax.experimental.pallas import tpu as pltpu

BF16 = jnp.bfloat16

# raw resident-operand budget (bytes) under which the whole-S-resident fused kernel is
# used; chosen to stay well under v7x's 64 MiB physical VMEM (v5e/v6e have 128 MiB).
_MONO_RAW_BYTES_BUDGET = 30 * (1 << 20)


# ---------------------------------------------------------------------------
# helpers
# ---------------------------------------------------------------------------
def _round_up(x, m):
    return ((x + m - 1) // m) * m


def _pad_to(a, shape):
    return jnp.pad(a, [(0, t - s) for s, t in zip(a.shape, shape)])


def _nbytes(*arrays):
    return sum(int(a.size) * a.dtype.itemsize for a in arrays)


# ---------------------------------------------------------------------------
# Kernel 1: fully fused, everything VMEM-resident (small/medium graphs)
# ---------------------------------------------------------------------------
def _gin_fused_kernel(eps, s_ref, x_ref, w1_ref, b1_ref, w2_ref, b2_ref,
                      wc_ref, bc_ref, p_ref, pinv_ref, o_ref, x_scr):
    num_layers = w1_ref.shape[0]          # static at trace time

    # bf16 activation resident in VMEM scratch across all layers
    x_scr[...] = x_ref[...]

    def layer(l):
        x_cur = x_scr[...]                                            # bf16
        # sum over neighbors (MXU, f32 accumulation) + (1+eps)*x self term in f32
        agg = jnp.dot(s_ref[...], x_cur, preferred_element_type=jnp.float32)
        agg = agg + (1.0 + eps) * x_cur.astype(jnp.float32)
        # MLP: Linear -> ReLU -> Linear   (bias add / ReLU in f32)
        h = jnp.dot(agg.astype(BF16), w1_ref[l],
                    preferred_element_type=jnp.float32) + b1_ref[l]
        h = jnp.maximum(h, 0.0)
        h = jnp.dot(h.astype(BF16), w2_ref[l],
                    preferred_element_type=jnp.float32) + b2_ref[l]
        # outer F.relu; dropout(training=False) is identity; store already cast to bf16
        x_scr[...] = jnp.maximum(h, 0.0).astype(BF16)

    if num_layers <= 4:
        for l in range(num_layers):       # short static unroll
            layer(l)
    else:                                 # deep nets: bound live ranges with fori_loop
        lax.fori_loop(0, num_layers, lambda l, c: (layer(l), c)[1], 0)

    # global mean pool (exact 0/1 indicator matmul, f32 reciprocal-count scale) + head
    pooled = jnp.dot(p_ref[...], x_scr[...], preferred_element_type=jnp.float32)
    pooled = pooled * pinv_ref[...]
    o_ref[...] = jnp.dot(pooled.astype(BF16), wc_ref[...],
                         preferred_element_type=jnp.float32) + bc_ref[...]


# ---------------------------------------------------------------------------
# Kernel 2: gridded fallback for graphs whose S does not fit in VMEM.
# grid = (num_layers, n_row_tiles); S streamed per row tile (auto double-buffered),
# activations ping-pong between two full-resident bf16 scratch buffers.
# ---------------------------------------------------------------------------
def _gin_grid_kernel(eps, num_layers, n_row_tiles,
                     s_ref, x_ref, w1_ref, b1_ref, w2_ref, b2_ref,
                     wc_ref, bc_ref, p_ref, pinv_ref, o_ref, xa, xb):
    l = pl.program_id(0)
    i = pl.program_id(1)
    tm = s_ref.shape[0]
    row0 = pl.multiple_of(i * tm, tm)

    @pl.when(jnp.logical_and(l == 0, i == 0))
    def _():
        xa[...] = x_ref[...]              # initialise ping buffer with input features

    def layer_step(src, dst):
        x_prev = src[...]                                             # (np_, kp) bf16
        agg = jnp.dot(s_ref[...], x_prev, preferred_element_type=jnp.float32)
        x_rows = src[pl.ds(row0, tm), :].astype(jnp.float32)
        agg = agg + (1.0 + eps) * x_rows
        h = jnp.dot(agg.astype(BF16), w1_ref[l],
                    preferred_element_type=jnp.float32) + b1_ref[l]
        h = jnp.maximum(h, 0.0)
        h = jnp.dot(h.astype(BF16), w2_ref[l],
                    preferred_element_type=jnp.float32) + b2_ref[l]
        dst[pl.ds(row0, tm), :] = jnp.maximum(h, 0.0).astype(BF16)

    @pl.when(l % 2 == 0)
    def _():
        layer_step(xa, xb)

    @pl.when(l % 2 == 1)
    def _():
        layer_step(xb, xa)

    # mean pooling + classifier after the last row tile of the last layer
    @pl.when(jnp.logical_and(l == num_layers - 1, i == n_row_tiles - 1))
    def _():
        final = xb if (num_layers % 2 == 1) else xa
        pooled = jnp.dot(p_ref[...], final[...], preferred_element_type=jnp.float32)
        pooled = pooled * pinv_ref[...]
        o_ref[...] = jnp.dot(pooled.astype(BF16), wc_ref[...],
                             preferred_element_type=jnp.float32) + bc_ref[...]


# ---------------------------------------------------------------------------
# Plain-JAX glue: graph structure -> dense operators, padding, init, forward
# ---------------------------------------------------------------------------
def build_adjacency(edge_index, num_nodes):
    src, dst = edge_index[0], edge_index[1]
    return jnp.zeros((num_nodes, num_nodes), jnp.float32).at[dst, src].add(1.0)


def build_mean_pool(batch, num_graphs):
    ind = (batch[None, :] == jnp.arange(num_graphs)[:, None]).astype(jnp.float32)
    counts = ind.sum(axis=1, keepdims=True)
    inv = jnp.where(counts > 0, 1.0 / jnp.maximum(counts, 1.0), 0.0)
    return ind, inv


def init_linear(key, fan_in, fan_out):
    # deterministic stand-in for torch.nn.Linear init: U(-1/sqrt(fan_in), 1/sqrt(fan_in))
    kw, kb = jax.random.split(key)
    bound = 1.0 / jnp.sqrt(jnp.float32(fan_in))
    w = jax.random.uniform(kw, (fan_in, fan_out), jnp.float32, -bound, bound)
    b = jax.random.uniform(kb, (fan_out,), jnp.float32, -bound, bound)
    return w, b


def init_gin_params(key, num_features, num_classes, hidden_dim, num_layers):
    params = {"convs": [], "classifier": None}
    in_dim = num_features
    for _ in range(num_layers):
        key, k1, k2 = jax.random.split(key, 3)
        w1, b1 = init_linear(k1, in_dim, hidden_dim)      # nn: Linear(in, hidden)
        w2, b2 = init_linear(k2, hidden_dim, hidden_dim)  # nn: Linear(hidden, hidden)
        params["convs"].append((w1, b1, w2, b2))
        in_dim = hidden_dim
    key, kc = jax.random.split(key)
    params["classifier"] = init_linear(kc, hidden_dim, num_classes)
    return params


def gin_forward(params, x, edge_index, batch, num_graphs, eps=0.0, force_grid=False):
    n, f = x.shape
    hidden = params["convs"][0][0].shape[1]
    num_classes = params["classifier"][0].shape[1]
    num_layers = len(params["convs"])

    np_ = _round_up(n, 128)                   # node dim (both dims of S, sublane of x)
    kp = _round_up(max(f, hidden), 128)       # feature / hidden lane dim
    cp = _round_up(num_classes, 128)          # class lane dim
    gp = _round_up(num_graphs, 8)             # graph (sublane) dim of the output

    adj = build_adjacency(edge_index, n)                 # f32 integer edge counts
    pool_ind, pool_inv = build_mean_pool(batch, num_graphs)

    # zero-padded, lane-dense operands (pad rows/cols contribute exact zeros;
    # counts and 0/1 indicators are exact in bf16, 1/|g| stays f32 in-kernel)
    s_p = _pad_to(adj, (np_, np_)).astype(BF16)
    p_p = _pad_to(pool_ind, (gp, np_)).astype(BF16)
    pinv_p = _pad_to(pool_inv, (gp, 1)).astype(jnp.float32)
    x_p = _pad_to(x, (np_, kp)).astype(BF16)

    w1s = jnp.stack([_pad_to(w1, (kp, kp)) for (w1, _, _, _) in params["convs"]]).astype(BF16)
    b1s = jnp.stack([_pad_to(b1.reshape(1, -1), (1, kp))
                     for (_, b1, _, _) in params["convs"]]).astype(jnp.float32)
    w2s = jnp.stack([_pad_to(w2, (kp, kp)) for (_, _, w2, _) in params["convs"]]).astype(BF16)
    b2s = jnp.stack([_pad_to(b2.reshape(1, -1), (1, kp))
                     for (_, _, _, b2) in params["convs"]]).astype(jnp.float32)
    w_c, b_c = params["classifier"]
    wc_p = _pad_to(w_c, (kp, cp)).astype(BF16)
    bc_p = _pad_to(b_c.reshape(1, -1), (1, cp)).astype(jnp.float32)

    common = (x_p, w1s, b1s, w2s, b2s, wc_p, bc_p, p_p, pinv_p)
    out_shape = jax.ShapeDtypeStruct((gp, cp), jnp.float32)
    scratch_act_bytes = np_ * kp * 2                       # bf16 activation scratch
    raw_bytes = _nbytes(s_p, *common) + gp * cp * 4 + scratch_act_bytes

    if (not force_grid) and raw_bytes <= _MONO_RAW_BYTES_BUDGET:
        # ---- fully fused, everything VMEM-resident -------------------------
        vmem_limit = int(min(1.5 * raw_bytes + (4 << 20), 127 << 20))
        out_p = pl.pallas_call(
            functools.partial(_gin_fused_kernel, float(eps)),
            out_shape=out_shape,
            scratch_shapes=[pltpu.VMEM((np_, kp), BF16)],          # resident activation
            compiler_params=pltpu.CompilerParams(vmem_limit_bytes=vmem_limit),
        )(s_p, *common)
    else:
        # ---- gridded: S streamed row-tile-wise, ping-pong bf16 activations --
        tm = 128
        for cand in (512, 256, 128):     # largest tile whose double-buffered S fits budget
            if np_ % cand == 0 and 2 * (2 * cand * np_) <= (16 << 20):
                tm = cand
                break
        n_row = np_ // tm

        per_iter = (2 * (tm * np_ * 2)            # double-buffered S row tile (bf16)
                    + 2 * _nbytes(*common)        # resident inputs (conservative 2x)
                    + 2 * gp * cp * 4             # output block
                    + 2 * scratch_act_bytes)      # two activation scratch buffers
        vmem_limit = int(min(per_iter + (8 << 20), 127 << 20))

        out_p = pl.pallas_call(
            functools.partial(_gin_grid_kernel, float(eps), num_layers, n_row),
            out_shape=out_shape,
            grid=(num_layers, n_row),
            in_specs=[
                pl.BlockSpec((tm, np_), lambda l, i: (i, 0)),                 # S row tile
                pl.BlockSpec((np_, kp), lambda l, i: (0, 0)),                 # x
                pl.BlockSpec((num_layers, kp, kp), lambda l, i: (0, 0, 0)),   # W1 stack
                pl.BlockSpec((num_layers, 1, kp), lambda l, i: (0, 0, 0)),    # b1 stack
                pl.BlockSpec((num_layers, kp, kp), lambda l, i: (0, 0, 0)),   # W2 stack
                pl.BlockSpec((num_layers, 1, kp), lambda l, i: (0, 0, 0)),    # b2 stack
                pl.BlockSpec((kp, cp), lambda l, i: (0, 0)),                  # Wc
                pl.BlockSpec((1, cp), lambda l, i: (0, 0)),                   # bc
                pl.BlockSpec((gp, np_), lambda l, i: (0, 0)),                 # pool indicator
                pl.BlockSpec((gp, 1), lambda l, i: (0, 0)),                   # 1/|graph|
            ],
            out_specs=pl.BlockSpec((gp, cp), lambda l, i: (0, 0)),
            scratch_shapes=[pltpu.VMEM((np_, kp), BF16),                      # ping
                            pltpu.VMEM((np_, kp), BF16)],                     # pong
            compiler_params=pltpu.CompilerParams(
                # layer axis and row axis both sequential: activations live in per-core
                # scratch, so cross-layer dependence forbids sharding rows across cores.
                dimension_semantics=("arbitrary", "arbitrary"),
                vmem_limit_bytes=vmem_limit),
        )(s_p, *common)

    return out_p[:num_graphs, :num_classes]


def gin_reference(params, x, edge_index, batch, num_graphs, eps=0.0):
    # plain-JAX reference with the same precision policy (bf16 operands, f32 accum)
    n = x.shape[0]
    s = build_adjacency(edge_index, n).astype(BF16)
    ind, inv = build_mean_pool(batch, num_graphs)
    p = ind.astype(BF16)
    h = x.astype(BF16)
    for (w1, b1, w2, b2) in params["convs"]:
        agg = (jnp.dot(s, h, preferred_element_type=jnp.float32)
               + (1.0 + eps) * h.astype(jnp.float32))
        t = jnp.dot(agg.astype(BF16), w1.astype(BF16),
                    preferred_element_type=jnp.float32) + b1[None, :]
        t = jnp.maximum(t, 0.0)
        t = jnp.dot(t.astype(BF16), w2.astype(BF16),
                    preferred_element_type=jnp.float32) + b2[None, :]
        h = jnp.maximum(t, 0.0).astype(BF16)
    w_c, b_c = params["classifier"]
    pooled = jnp.dot(p, h, preferred_element_type=jnp.float32) * inv
    return jnp.dot(pooled.astype(BF16), w_c.astype(BF16),
                   preferred_element_type=jnp.float32) + b_c[None, :]


# ---------------------------------------------------------------------------
if __name__ == "__main__":
    key = jax.random.PRNGKey(0)

    # ---------------- case 1: toy graph -> fully fused VMEM-resident path ----
    num_features, hidden_dim, num_classes, num_layers = 8, 32, 4, 2
    num_nodes, num_graphs = 16, 2

    key, kx, ke, kprm = jax.random.split(key, 4)
    x = jax.random.normal(kx, (num_nodes, num_features), jnp.float32)

    half = num_nodes // num_graphs
    ring_src = jnp.arange(num_nodes, dtype=jnp.int32)
    ring_dst = jnp.where(ring_src % half == half - 1,
                         ring_src - (half - 1), ring_src + 1).astype(jnp.int32)
    extra_src = jax.random.randint(ke, (16,), 0, num_nodes, dtype=jnp.int32)
    extra_dst = (extra_src // half) * half + (extra_src + 3) % half
    edge_index = jnp.stack([jnp.concatenate([ring_src, extra_src]),
                            jnp.concatenate([ring_dst, extra_dst])], axis=0)
    batch = jnp.repeat(jnp.arange(num_graphs, dtype=jnp.int32), half)

    params = init_gin_params(kprm, num_features, num_classes, hidden_dim, num_layers)

    out = jax.block_until_ready(gin_forward(params, x, edge_index, batch, num_graphs))
    ref = gin_reference(params, x, edge_index, batch, num_graphs)
    assert out.shape == (num_graphs, num_classes)
    assert jnp.allclose(out, ref, atol=1e-2, rtol=1e-2), "monolithic path mismatch"

    # ---------------- case 2: larger graph -> gridded S-streamed path --------
    num_features2, hidden_dim2, num_classes2, num_layers2 = 16, 64, 3, 3
    num_nodes2, num_graphs2 = 300, 2                       # pads to 384 -> 3 S row tiles

    key, kx2, ke2, kprm2 = jax.random.split(key, 4)
    x2 = jax.random.normal(kx2, (num_nodes2, num_features2), jnp.float32)

    half2 = num_nodes2 // num_graphs2
    src2 = jnp.arange(num_nodes2, dtype=jnp.int32)
    dst2 = jnp.where(src2 % half2 == half2 - 1,
                     src2 - (half2 - 1), src2 + 1).astype(jnp.int32)
    extra_src2 = jax.random.randint(ke2, (64,), 0, num_nodes2, dtype=jnp.int32)
    extra_dst2 = (extra_src2 // half2) * half2 + (extra_src2 + 7) % half2
    edge_index2 = jnp.stack([jnp.concatenate([src2, extra_src2]),
                             jnp.concatenate([dst2, extra_dst2])], axis=0)
    batch2 = jnp.repeat(jnp.arange(num_graphs2, dtype=jnp.int32), half2)

    params2 = init_gin_params(kprm2, num_features2, num_classes2, hidden_dim2, num_layers2)

    out2 = jax.block_until_ready(
        gin_forward(params2, x2, edge_index2, batch2, num_graphs2, force_grid=True))
    ref2 = gin_reference(params2, x2, edge_index2, batch2, num_graphs2)
    assert out2.shape == (num_graphs2, num_classes2)
    assert jnp.allclose(out2, ref2, atol=1e-2, rtol=1e-2), "gridded path mismatch"

    print("KERNEL_OK")
</pallas_src>

<mosaic_0001>
module attributes {stable_mosaic.version = 11 : i64} {
  func.func @_gin_fused_kernel(%arg0: memref<128x128xbf16, #tpu.memory_space<vmem>>, %arg1: memref<128x128xbf16, #tpu.memory_space<vmem>>, %arg2: memref<2x128x128xbf16, #tpu.memory_space<vmem>>, %arg3: memref<2x1x128xf32, #tpu.memory_space<vmem>>, %arg4: memref<2x128x128xbf16, #tpu.memory_space<vmem>>, %arg5: memref<2x1x128xf32, #tpu.memory_space<vmem>>, %arg6: memref<128x128xbf16, #tpu.memory_space<vmem>>, %arg7: memref<1x128xf32, #tpu.memory_space<vmem>>, %arg8: memref<8x128xbf16, #tpu.memory_space<vmem>>, %arg9: memref<8x1xf32, #tpu.memory_space<vmem>>, %arg10: memref<8x128xf32, #tpu.memory_space<vmem>>, %arg11: memref<128x128xbf16, #tpu.memory_space<vmem>>) attributes {dimension_semantics = [], scalar_prefetch = 0 : i64, scratch_operands = 1 : i64, tpu.core_type = #tpu.core_type<tc>} {
    %c0 = arith.constant 0 : index
    %c0_0 = arith.constant 0 : index
    %0 = vector.load %arg1[%c0, %c0_0] : memref<128x128xbf16, #tpu.memory_space<vmem>>, vector<128x128xbf16>
    %c0_1 = arith.constant 0 : index
    %c0_2 = arith.constant 0 : index
    %1 = vector.load %arg11[%c0_1, %c0_2] : memref<128x128xbf16, #tpu.memory_space<vmem>>, vector<128x128xbf16>
    tpu.vector_store %arg11[%c0_1, %c0_2], %0 {strides = array<i32>} : memref<128x128xbf16, #tpu.memory_space<vmem>>, vector<128x128xbf16>,
    %c0_3 = arith.constant 0 : index
    %c0_4 = arith.constant 0 : index
    %2 = vector.load %arg11[%c0_3, %c0_4] : memref<128x128xbf16, #tpu.memory_space<vmem>>, vector<128x128xbf16>
    %c0_5 = arith.constant 0 : index
    %c0_6 = arith.constant 0 : index
    %3 = vector.load %arg0[%c0_5, %c0_6] : memref<128x128xbf16, #tpu.memory_space<vmem>>, vector<128x128xbf16>
    %cst = arith.constant dense<0.000000e+00> : vector<128x128xf32>
    %4 = tpu.matmul %3, %2, %cst {dimension_numbers = #tpu.dot_dimension_numbers<[1], [0], [0], [1], [0, 0, 1, 1], [], []>} : vector<128x128xbf16>, vector<128x128xbf16>, vector<128x128xf32> -> vector<128x128xf32>
    %5 = arith.extf %2 : vector<128x128xbf16> to vector<128x128xf32>
    %cst_7 = arith.constant 1.000000e+00 : f32
    %6 = vector.broadcast %cst_7 : f32 to vector<128x128xf32>
    %7 = arith.mulf %6, %5 : vector<128x128xf32>
    %8 = arith.addf %4, %7 : vector<128x128xf32>
    %9 = arith.truncf %8 : vector<128x128xf32> to vector<128x128xbf16>
    %c0_8 = arith.constant 0 : index
    %c0_9 = arith.constant 0 : index
    %c0_10 = arith.constant 0 : index
    %10 = vector.load %arg2[%c0_8, %c0_9, %c0_10] : memref<2x128x128xbf16, #tpu.memory_space<vmem>>, vector<1x128x128xbf16>
    %11 = vector.shape_cast %10 : vector<1x128x128xbf16> to vector<128x128xbf16>
    %cst_11 = arith.constant dense<0.000000e+00> : vector<128x128xf32>
    %12 = tpu.matmul %9, %11, %cst_11 {dimension_numbers = #tpu.dot_dimension_numbers<[1], [0], [0], [1], [0, 0, 1, 1], [], []>} : vector<128x128xbf16>, vector<128x128xbf16>, vector<128x128xf32> -> vector<128x128xf32>
    %c0_12 = arith.constant 0 : index
    %c0_13 = arith.constant 0 : index
    %c0_14 = arith.constant 0 : index
    %13 = vector.load %arg3[%c0_12, %c0_13, %c0_14] : memref<2x1x128xf32, #tpu.memory_space<vmem>>, vector<1x1x128xf32>
    %14 = vector.shape_cast %13 : vector<1x1x128xf32> to vector<1x128xf32>
    %15 = vector.broadcast %14 : vector<1x128xf32> to vector<128x128xf32>
    %16 = arith.addf %12, %15 : vector<128x128xf32>
    %cst_15 = arith.constant 0.000000e+00 : f32
    %17 = vector.broadcast %cst_15 : f32 to vector<128x128xf32>
    %18 = arith.maximumf %16, %17 : vector<128x128xf32>
    %19 = arith.truncf %18 : vector<128x128xf32> to vector<128x128xbf16>
    %c0_16 = arith.constant 0 : index
    %c0_17 = arith.constant 0 : index
    %c0_18 = arith.constant 0 : index
    %20 = vector.load %arg4[%c0_16, %c0_17, %c0_18] : memref<2x128x128xbf16, #tpu.memory_space<vmem>>, vector<1x128x128xbf16>
    %21 = vector.shape_cast %20 : vector<1x128x128xbf16> to vector<128x128xbf16>
    %cst_19 = arith.constant dense<0.000000e+00> : vector<128x128xf32>
    %22 = tpu.matmul %19, %21, %cst_19 {dimension_numbers = #tpu.dot_dimension_numbers<[1], [0], [0], [1], [0, 0, 1, 1], [], []>} : vector<128x128xbf16>, vector<128x128xbf16>, vector<128x128xf32> -> vector<128x128xf32>
    %c0_20 = arith.constant 0 : index
    %c0_21 = arith.constant 0 : index
    %c0_22 = arith.constant 0 : index
    %23 = vector.load %arg5[%c0_20, %c0_21, %c0_22] : memref<2x1x128xf32, #tpu.memory_space<vmem>>, vector<1x1x128xf32>
    %24 = vector.shape_cast %23 : vector<1x1x128xf32> to vector<1x128xf32>
    %25 = vector.broadcast %24 : vector<1x128xf32> to vector<128x128xf32>
    %26 = arith.addf %22, %25 : vector<128x128xf32>
    %cst_23 = arith.constant 0.000000e+00 : f32
    %27 = vector.broadcast %cst_23 : f32 to vector<128x128xf32>
    %28 = arith.maximumf %26, %27 : vector<128x128xf32>
    %29 = arith.truncf %28 : vector<128x128xf32> to vector<128x128xbf16>
    %c0_24 = arith.constant 0 : index
    %c0_25 = arith.constant 0 : index
    %30 = vector.load %arg11[%c0_24, %c0_25] : memref<128x128xbf16, #tpu.memory_space<vmem>>, vector<128x128xbf16>
    tpu.vector_store %arg11[%c0_24, %c0_25], %29 {strides = array<i32>} : memref<128x128xbf16, #tpu.memory_space<vmem>>, vector<128x128xbf16>,
    %c0_26 = arith.constant 0 : index
    %c0_27 = arith.constant 0 : index
    %31 = vector.load %arg11[%c0_26, %c0_27] : memref<128x128xbf16, #tpu.memory_space<vmem>>, vector<128x128xbf16>
    %c0_28 = arith.constant 0 : index
    %c0_29 = arith.constant 0 : index
    %32 = vector.load %arg0[%c0_28, %c0_29] : memref<128x128xbf16, #tpu.memory_space<vmem>>, vector<128x128xbf16>
    %cst_30 = arith.constant dense<0.000000e+00> : vector<128x128xf32>
    %33 = tpu.matmul %32, %31, %cst_30 {dimension_numbers = #tpu.dot_dimension_numbers<[1], [0], [0], [1], [0, 0, 1, 1], [], []>} : vector<128x128xbf16>, vector<128x128xbf16>, vector<128x128xf32> -> vector<128x128xf32>
    %34 = arith.extf %31 : vector<128x128xbf16> to vector<128x128xf32>
    %cst_31 = arith.constant 1.000000e+00 : f32
    %35 = vector.broadcast %cst_31 : f32 to vector<128x128xf32>
    %36 = arith.mulf %35, %34 : vector<128x128xf32>
    %37 = arith.addf %33, %36 : vector<128x128xf32>
    %38 = arith.truncf %37 : vector<128x128xf32> to vector<128x128xbf16>
    %c1 = arith.constant 1 : index
    %c0_32 = arith.constant 0 : index
    %c0_33 = arith.constant 0 : index
    %39 = vector.load %arg2[%c1, %c0_32, %c0_33] : memref<2x128x128xbf16, #tpu.memory_space<vmem>>, vector<1x128x128xbf16>
    %40 = vector.shape_cast %39 : vector<1x128x128xbf16> to vector<128x128xbf16>
    %cst_34 = arith.constant dense<0.000000e+00> : vector<128x128xf32>
    %41 = tpu.matmul %38, %40, %cst_34 {dimension_numbers = #tpu.dot_dimension_numbers<[1], [0], [0], [1], [0, 0, 1, 1], [], []>} : vector<128x128xbf16>, vector<128x128xbf16>, vector<128x128xf32> -> vector<128x128xf32>
    %c1_35 = arith.constant 1 : index
    %c0_36 = arith.constant 0 : index
    %c0_37 = arith.constant 0 : index
    %42 = vector.load %arg3[%c1_35, %c0_36, %c0_37] : memref<2x1x128xf32, #tpu.memory_space<vmem>>, vector<1x1x128xf32>
    %43 = vector.shape_cast %42 : vector<1x1x128xf32> to vector<1x128xf32>
    %44 = vector.broadcast %43 : vector<1x128xf32> to vector<128x128xf32>
    %45 = arith.addf %41, %44 : vector<128x128xf32>
    %cst_38 = arith.constant 0.000000e+00 : f32
    %46 = vector.broadcast %cst_38 : f32 to vector<128x128xf32>
    %47 = arith.maximumf %45, %46 : vector<128x128xf32>
    %48 = arith.truncf %47 : vector<128x128xf32> to vector<128x128xbf16>
    %c1_39 = arith.constant 1 : index
    %c0_40 = arith.constant 0 : index
    %c0_41 = arith.constant 0 : index
    %49 = vector.load %arg4[%c1_39, %c0_40, %c0_41] : memref<2x128x128xbf16, #tpu.memory_space<vmem>>, vector<1x128x128xbf16>
    %50 = vector.shape_cast %49 : vector<1x128x128xbf16> to vector<128x128xbf16>
    %cst_42 = arith.constant dense<0.000000e+00> : vector<128x128xf32>
    %51 = tpu.matmul %48, %50, %cst_42 {dimension_numbers = #tpu.dot_dimension_numbers<[1], [0], [0], [1], [0, 0, 1, 1], [], []>} : vector<128x128xbf16>, vector<128x128xbf16>, vector<128x128xf32> -> vector<128x128xf32>
    %c1_43 = arith.constant 1 : index
    %c0_44 = arith.constant 0 : index
    %c0_45 = arith.constant 0 : index
    %52 = vector.load %arg5[%c1_43, %c0_44, %c0_45] : memref<2x1x128xf32, #tpu.memory_space<vmem>>, vector<1x1x128xf32>
    %53 = vector.shape_cast %52 : vector<1x1x128xf32> to vector<1x128xf32>
    %54 = vector.broadcast %53 : vector<1x128xf32> to vector<128x128xf32>
    %55 = arith.addf %51, %54 : vector<128x128xf32>
    %cst_46 = arith.constant 0.000000e+00 : f32
    %56 = vector.broadcast %cst_46 : f32 to vector<128x128xf32>
    %57 = arith.maximumf %55, %56 : vector<128x128xf32>
    %58 = arith.truncf %57 : vector<128x128xf32> to vector<128x128xbf16>
    %c0_47 = arith.constant 0 : index
    %c0_48 = arith.constant 0 : index
    %59 = vector.load %arg11[%c0_47, %c0_48] : memref<128x128xbf16, #tpu.memory_space<vmem>>, vector<128x128xbf16>
    tpu.vector_store %arg11[%c0_47, %c0_48], %58 {strides = array<i32>} : memref<128x128xbf16, #tpu.memory_space<vmem>>, vector<128x128xbf16>,
    %c0_49 = arith.constant 0 : index
    %c0_50 = arith.constant 0 : index
    %60 = vector.load %arg8[%c0_49, %c0_50] : memref<8x128xbf16, #tpu.memory_space<vmem>>, vector<8x128xbf16>
    %c0_51 = arith.constant 0 : index
    %c0_52 = arith.constant 0 : index
    %61 = vector.load %arg11[%c0_51, %c0_52] : memref<128x128xbf16, #tpu.memory_space<vmem>>, vector<128x128xbf16>
    %cst_53 = arith.constant dense<0.000000e+00> : vector<8x128xf32>
    %62 = tpu.matmul %60, %61, %cst_53 {dimension_numbers = #tpu.dot_dimension_numbers<[1], [0], [0], [1], [0, 0, 1, 1], [], []>} : vector<8x128xbf16>, vector<128x128xbf16>, vector<8x128xf32> -> vector<8x128xf32>
    %c0_54 = arith.constant 0 : index
    %c0_55 = arith.constant 0 : index
    %63 = vector.load %arg9[%c0_54, %c0_55] : memref<8x1xf32, #tpu.memory_space<vmem>>, vector<8x1xf32>
    %64 = vector.broadcast %63 : vector<8x1xf32> to vector<8x128xf32>
    %65 = arith.mulf %62, %64 : vector<8x128xf32>
    %66 = arith.truncf %65 : vector<8x128xf32> to vector<8x128xbf16>
    %c0_56 = arith.constant 0 : index
    %c0_57 = arith.constant 0 : index
    %67 = vector.load %arg6[%c0_56, %c0_57] : memref<128x128xbf16, #tpu.memory_space<vmem>>, vector<128x128xbf16>
    %cst_58 = arith.constant dense<0.000000e+00> : vector<8x128xf32>
    %68 = tpu.matmul %66, %67, %cst_58 {dimension_numbers = #tpu.dot_dimension_numbers<[1], [0], [0], [1], [0, 0, 1, 1], [], []>} : vector<8x128xbf16>, vector<128x128xbf16>, vector<8x128xf32> -> vector<8x128xf32>
    %c0_59 = arith.constant 0 : index
    %c0_60 = arith.constant 0 : index
    %69 = vector.load %arg7[%c0_59, %c0_60] : memref<1x128xf32, #tpu.memory_space<vmem>>, vector<1x128xf32>
    %70 = vector.broadcast %69 : vector<1x128xf32> to vector<8x128xf32>
    %71 = arith.addf %68, %70 : vector<8x128xf32>
    %c0_61 = arith.constant 0 : index
    %c0_62 = arith.constant 0 : index
    %72 = vector.load %arg10[%c0_61, %c0_62] : memref<8x128xf32, #tpu.memory_space<vmem>>, vector<8x128xf32>
    tpu.vector_store %arg10[%c0_61, %c0_62], %71 {strides = array<i32>} : memref<8x128xf32, #tpu.memory_space<vmem>>, vector<8x128xf32>,
    return
  }
}

</mosaic_0001>

<bundles_post_ra>
// kernel: tpu_custom_call.1
= control target key start
LH: loop header
LB: loop body
LE: loop exit
PB: predicated region body
PF: predicated region fallthrough
CT: control target
= control target key end

     0   :  { %15 = vsyncpa [#allocation4], 0  ;;  %s2133_s0 = inlined_call_operand.hbm [shape: bf16[128,128], index: 0, kind: input, shape index: {}]   ;;  %s2134_s1 = inlined_call_operand.hbm [shape: bf16[128,128], index: 1, kind: input, shape index: {}]   ;;  %s2135_s2 = inlined_call_operand.hbm [shape: bf16[2,128,128], index: 2, kind: input, shape index: {}]   ;;  %s2136_s3 = inlined_call_operand.vmem [shape: f32[2,1,128], index: 3, kind: input, shape index: {}]   ;;  %s2137_s4 = inlined_call_operand.hbm [shape: bf16[2,128,128], index: 4, kind: input, shape index: {}]   ;;  %s2138_s5 = inlined_call_operand.vmem [shape: f32[2,1,128], index: 5, kind: input, shape index: {}]   ;;  %s2139_s6 = inlined_call_operand.hbm [shape: bf16[128,128], index: 6, kind: input, shape index: {}]   ;;  %s2140_s7 = inlined_call_operand.vmem [shape: f32[1,128], index: 7, kind: input, shape index: {}]   ;;  %s2141_s8 = inlined_call_operand.vmem [shape: bf16[8,128], index: 8, kind: input, shape index: {}]   ;;  %s2142_s9 = inlined_call_operand.vmem [shape: f32[8,1], index: 9, kind: input, shape index: {}]   ;;  %s2143_s10 = inlined_call_operand.hbm [shape: f32[8,128], index: 10, kind: output, shape index: {}]  }
   0x1   :  { %16 = vsyncpa [#allocation7], 0 }
   0x2   :  { %17 = vsyncpa [#allocation10], 0 }
   0x3   :  { %18 = vsyncpa [#allocation5], 0  ;;  %s36_s15 = sshll.u32 %s2134_s1, 4  ;;  %s2030_s16 = smov [#allocation6]   ;;  %s37_s15 = int_to_ptr.hbm [resolvable:$true] %s36_s15 }
   0x4   :  { %s38_s17 = sshll.u32 %s2030_s16, 4  ;;  %s64_s20 = sshll.u32 %s2137_s4, 4  ;;  %s39_s17 = int_to_ptr.vmem [resolvable:$true] %s38_s17  ;;  %s65_s20 = int_to_ptr.hbm [resolvable:$true] %s64_s20 }
   0x5   :  { %s2031_s21 = smov 64   ;;  %s2032_s22 = smov 4  }
   0x6   :  { %44 = dma.hbm_to_vmem [thread:$0]  %s37_s15, 1024, %s39_s17, [#allocation7], %s2031_s21, %s2031_s21, %s2032_s22  }
   0x7   :  { %s2033_s23 = smov [#allocation9]   ;;  %s23_s27 = sshll.u32 %s2133_s0, 4  ;;  %s24_s27 = int_to_ptr.hbm [resolvable:$true] %s23_s27 }
   0x8   :  { %s66_s24 = sshll.u32 %s2033_s23, 4  ;;  %s49_s29 = sshll.u32 %s2135_s2, 4  ;;  %s67_s24 = int_to_ptr.vmem [resolvable:$true] %s66_s24  ;;  %s50_s29 = int_to_ptr.hbm [resolvable:$true] %s49_s29 }
   0x9   :  { %72 = dma.hbm_to_vmem [thread:$0]  %s65_s20, 2048, %s67_s24, [#allocation10], %s2031_s21, %s2031_s21, %s2032_s22  }
   0xa   :  { %s2034_s30 = smov [#allocation3]   ;;  %s2035_s4 = smov [#allocation8]  }
   0xb   :  { %s25_s11 = sshll.u32 %s2034_s30, 4  ;;  %s51_s12 = sshll.u32 %s2035_s4, 4  ;;  %s26_s11 = int_to_ptr.vmem [resolvable:$true] %s25_s11  ;;  %s52_s12 = int_to_ptr.vmem [resolvable:$true] %s51_s12 }
   0xc   :  { %31 = dma.hbm_to_vmem [thread:$0]  %s24_s27, 1024, %s26_s11, [#allocation4], %s2031_s21, %s2031_s21, %s2032_s22  }
   0xd   :  { %s79_s15 = sshll.u32 %s2139_s6, 4  ;;  %s2036_s0 = smov [#allocation11]   ;;  %s80_s15 = int_to_ptr.hbm [resolvable:$true] %s79_s15 }
   0xe   :  { %57 = dma.hbm_to_vmem [thread:$0]  %s50_s29, 2048, %s52_s12, [#allocation7], %s2031_s21, %s2031_s21, %s2032_s22  }
   0xf   :  { %s81_s16 = sshll.u32 %s2036_s0, 4  ;;  %s82_s16 = int_to_ptr.vmem [resolvable:$true] %s81_s16 }
  0x10   :  { %87 = dma.hbm_to_vmem [thread:$0]  %s80_s15, 1024, %s82_s16, [#allocation10], %s2031_s21, %s2031_s21, %s2032_s22  }
  0x11   :  { %2022 = dma.done.wait [#allocation4], 1024  }
  0x12   :  { %2023 = vsyncadd [#allocation4], 4294966272 }
  0x13   :  { %2024 = dma.done.wait [#allocation7], 3072  }
  0x14   :  { %2025 = vsyncadd [#allocation7], 4294964224 }
  0x15   :  { %2026 = dma.done.wait [#allocation10], 3072  }
  0x16   :  { %2027 = vsyncadd [#allocation10], 4294964224  ;;  %v128_v0 = vld [vmem:[#allocation6 + $0x38] sm:$0xff]   ;;  %v126_v1 = vld [vmem:[#allocation6 + $0x30] sm:$0xff]   ;;  %s2038_s26 = smov [#allocation12]   ;;  %s1339_s29 = sshll.u32 %s2143_s10, 4  ;;  %s1340_s29 = int_to_ptr.hbm [resolvable:$true] %s1339_s29 }
  0x17   :  { %v124_v2 = vld [vmem:[#allocation6 + $0x28] sm:$0xff]   ;;  %144 = vst [vmem:[#allocation2 + $0x38] sm:$0xff] %v128_v0   ;;  %v122_v3 = vld [vmem:[#allocation6 + $0x20] sm:$0xff]   ;;  %v120_v4 = vld [vmem:[#allocation6 + $0x18] sm:$0xff]   ;;  %s1337_s27 = sshll.u32 %s2038_s26, 4  ;;  %s1338_s27 = int_to_ptr.vmem [resolvable:$true] %s1337_s27 }
  0x18   :  { %142 = vst [vmem:[#allocation2 + $0x30] sm:$0xff] %v126_v1   ;;  %v118_v5 = vld [vmem:[#allocation6 + $0x10] sm:$0xff]   ;;  %v116_v6 = vld [vmem:[#allocation6 + $0x8] sm:$0xff]   ;;  %v114_v7 = vld [vmem:[#allocation6] sm:$0xff]  }
  0x19   :  { %140 = vst [vmem:[#allocation2 + $0x28] sm:$0xff] %v124_v2   ;;  %v1681_v16 = vld [vmem:[#allocation3] sm:$0xff]  ;;  %v1682_v17 = vld [vmem:[#allocation3 + $0x8] sm:$0xff]  ;;  %v1683_v19 = vld [vmem:[#allocation3 + $0x10] sm:$0xff] }
  0x1a   :  { %138 = vst [vmem:[#allocation2 + $0x20] sm:$0xff] %v122_v3   ;;  %v1686_v18 = vld [vmem:[#allocation3 + $0x28] sm:$0xff]  ;;  %v1687_v20 = vld [vmem:[#allocation3 + $0x30] sm:$0xff]  ;;  %v1696_v21 = vld [vmem:[#allocation8 + $0x38] sm:$0xff] }
  0x1b   :  { %136 = vst [vmem:[#allocation2 + $0x18] sm:$0xff] %v120_v4   ;;  %415 = vmatpush.bf16.msra.mxu1 %v1696_v21  ;;  %v1695_v22 = vld [vmem:[#allocation8 + $0x30] sm:$0xff]  ;;  %1855 = vmatpush.bf16.msra.mxu3 %v1696_v21  ;;  %v1694_v23 = vld [vmem:[#allocation8 + $0x28] sm:$0xff]  ;;  %v1693_v24 = vld [vmem:[#allocation8 + $0x20] sm:$0xff] }
  0x1c   :  { %134 = vst [vmem:[#allocation2 + $0x10] sm:$0xff] %v118_v5   ;;  %v1684_v25 = vld [vmem:[#allocation3 + $0x18] sm:$0xff]  ;;  %v1685_v28 = vld [vmem:[#allocation3 + $0x20] sm:$0xff]  ;;  %v1691_v29 = vld [vmem:[#allocation8 + $0x10] sm:$0xff] }
  0x1d   :  { %132 = vst [vmem:[#allocation2 + $0x8] sm:$0xff] %v116_v6   ;;  %v1688_v26 = vld [vmem:[#allocation3 + $0x38] sm:$0xff]  ;;  %v1690_v30 = vld [vmem:[#allocation8 + $0x8] sm:$0xff]  ;;  %v1689_v31 = vld [vmem:[#allocation8] sm:$0xff] }
  0x1e   :  { %v1680_v8 = vld [vmem:[#allocation2 + $0x38] sm:$0xff]  ;;  %130 = vst [vmem:[#allocation2] sm:$0xff] %v114_v7   ;;  %v1703_v5 = vld [vmem:[#allocation9 + $0x30] sm:$0xff] }
  0x1f   :  { %290 = vmatpush.bf16.msra.mxu0 %v1680_v8  ;;  %v1679_v9 = vld [vmem:[#allocation2 + $0x30] sm:$0xff]  ;;  %1847 = vmatpush.bf16.msra.mxu2 %v1680_v8  ;;  %v1692_v27 = vld [vmem:[#allocation8 + $0x18] sm:$0xff] }
  0x20   :  { %v1678_v10 = vld [vmem:[#allocation2 + $0x28] sm:$0xff]  ;;  %416 = vmatpush.bf16.msra.mxu1 %v1695_v22  ;;  %1856 = vmatpush.bf16.msra.mxu3 %v1695_v22  ;;  %v158_v63 = vld [vmem:[#allocation2 + $0x30] sm:$0xff]   ;;  %v1704_v3 = vld [vmem:[#allocation9 + $0x38] sm:$0xff] }
  0x21   :  { %v1677_v11 = vld [vmem:[#allocation2 + $0x20] sm:$0xff]  ;;  %v156_v48 = vld [vmem:[#allocation2 + $0x28] sm:$0xff]   ;;  %v190_v2 = vunpack.c.l.bf16 %v158_v63  ;;  %v191_v4 = vunpack.c.h.bf16 %v158_v63 }
  0x22   :  { %v1676_v12 = vld [vmem:[#allocation2 + $0x18] sm:$0xff]  ;;  %v188_v50 = vunpack.c.l.bf16 %v156_v48  ;;  %v189_v53 = vunpack.c.h.bf16 %v156_v48 }
  0x23   :  { %291 = vmatpush.bf16.msra.mxu0 %v1679_v9  ;;  %1848 = vmatpush.bf16.msra.mxu2 %v1679_v9  ;;  %v1675_v13 = vld [vmem:[#allocation2 + $0x10] sm:$0xff]  ;;  %v152_v9 = vld [vmem:[#allocation2 + $0x18] sm:$0xff]  }
  0x24   :  { %v1674_v14 = vld [vmem:[#allocation2 + $0x8] sm:$0xff]  ;;  %417 = vmatpush.bf16.msra.mxu1 %v1694_v23  ;;  %1857 = vmatpush.bf16.msra.mxu3 %v1694_v23  ;;  %v150_v55 = vld [vmem:[#allocation2 + $0x10] sm:$0xff]  }
  0x25   :  { %v1673_v15 = vld [vmem:[#allocation2] sm:$0xff]  ;;  %v148_v41 = vld [vmem:[#allocation2 + $0x8] sm:$0xff]   ;;  %v182_v57 = vunpack.c.l.bf16 %v150_v55  ;;  %v183_v58 = vunpack.c.h.bf16 %v150_v55 }
  0x26   :  { %v146_v33 = vld [vmem:[#allocation2] sm:$0xff]   ;;  %v180_v42 = vunpack.c.l.bf16 %v148_v41  ;;  %v181_v43 = vunpack.c.h.bf16 %v148_v41 }
  0x27   :  { %292 = vmatpush.bf16.msra.mxu0 %v1678_v10  ;;  %1849 = vmatpush.bf16.msra.mxu2 %v1678_v10  ;;  %v178_v34 = vunpack.c.l.bf16 %v146_v33  ;;  %v179_v35 = vunpack.c.h.bf16 %v146_v33  ;;  %v1873_v41 = vld [vmem:[%s2136_s3] ss:$0 sm:$0xff] }
  0x28   :  { %418 = vmatpush.bf16.msra.mxu1 %v1693_v24  ;;  %1858 = vmatpush.bf16.msra.mxu3 %v1693_v24 }
  0x2b   :  { %293 = vmatpush.bf16.msra.mxu0 %v1677_v11  ;;  %1850 = vmatpush.bf16.msra.mxu2 %v1677_v11  ;;  %v1702_v11 = vld [vmem:[#allocation9 + $0x28] sm:$0xff] }
  0x2c   :  { %419 = vmatpush.bf16.msra.mxu1 %v1692_v27  ;;  %1859 = vmatpush.bf16.msra.mxu3 %v1692_v27  ;;  %v154_v27 = vld [vmem:[#allocation2 + $0x20] sm:$0xff]  }
  0x2f   :  { %294 = vmatpush.bf16.msra.mxu0 %v1676_v12  ;;  %1851 = vmatpush.bf16.msra.mxu2 %v1676_v12 }
  0x30   :  { %420 = vmatpush.bf16.msra.mxu1 %v1691_v29  ;;  %1860 = vmatpush.bf16.msra.mxu3 %v1691_v29 }
  0x33   :  { %295 = vmatpush.bf16.msra.mxu0 %v1675_v13  ;;  %1852 = vmatpush.bf16.msra.mxu2 %v1675_v13  ;;  %v184_v13 = vunpack.c.l.bf16 %v152_v9 }
  0x34   :  { %421 = vmatpush.bf16.msra.mxu1 %v1690_v30  ;;  %1861 = vmatpush.bf16.msra.mxu3 %v1690_v30  ;;  %v186_v30 = vunpack.c.l.bf16 %v154_v27 }
  0x37   :  { %296 = vmatpush.bf16.msra.mxu0 %v1674_v14  ;;  %1853 = vmatpush.bf16.msra.mxu2 %v1674_v14  ;;  %v185_v14 = vunpack.c.h.bf16 %v152_v9 }
  0x38   :  { %422 = vmatpush.bf16.msra.mxu1 %v1689_v31  ;;  %1862 = vmatpush.bf16.msra.mxu3 %v1689_v31  ;;  %v187_v31 = vunpack.c.h.bf16 %v154_v27 }
  0x3b   :  { %297 = vmatpush.bf16.msra.mxu0 %v1673_v15  ;;  %1854 = vmatpush.bf16.msra.mxu2 %v1673_v15  ;;  %v1701_v15 = vld [vmem:[#allocation9 + $0x20] sm:$0xff] }
  0x3e   :  { %298 = vmatmul.bf16.vlgmr.msra.gmra.mxu0 %v1681_v16  ;;  %323 = vmatmul.bf16.vlgmr.msra.gmra.mxu2 %v1686_v18 }
  0x3f   :  { %556 = vmatpush.bf16.msrb.mxu2 %v1704_v3 }
  0x43   :  { %557 = vmatpush.bf16.msrb.mxu2 %v1703_v5 }
  0x47   :  { %558 = vmatpush.bf16.msrb.mxu2 %v1702_v11 }
  0x4b   :  { %559 = vmatpush.bf16.msrb.mxu2 %v1701_v15 }
  0x4e   :  { %303 = vmatmul.bf16.gmra.mxu0 %v1682_v17  ;;  %328 = vmatmul.bf16.gmra.mxu2 %v1687_v20 }
  0x5e   :  { %308 = vmatmul.bf16.gmra.mxu0 %v1683_v19  ;;  %333 = vmatmul.bf16.gmra.mxu2 %v1688_v26  ;;  %v160_v19 = vld [vmem:[#allocation2 + $0x38] sm:$0xff]  }
  0x5f   :  { %v192_v22 = vunpack.c.l.bf16 %v160_v19  ;;  %v193_v23 = vunpack.c.h.bf16 %v160_v19 }
  0x6e   :  { %313 = vmatmul.bf16.gmra.mxu0 %v1684_v25 }
  0x7e   :  { %318 = vmatmul.bf16.gmra.mxu0 %v1685_v28 }
  0xbb   :  { %v299_v32 = vpop.f32.mrf.mxu0 }
  0xbc   :  { %v300_v37 = vadd.f32 %v299_v32, %v178_v34 }
  0xc1   :  { %v324_v47 = vpop.f32.mrf.mxu2 }
  0xc2   :  { %v325_v52 = vadd.f32 %v324_v47, %v188_v50 }
  0xc3   :  { %v301_v36 = vpop.f32.mrf.mxu0 }
  0xc4   :  { %v302_v38 = vadd.f32 %v301_v36, %v179_v35  ;;  %v1700_v36 = vld [vmem:[#allocation9 + $0x18] sm:$0xff] }
  0xc5   :  { %560 = vmatpush.bf16.msrb.mxu2 %v1700_v36 }
  0xc6   :  { %v339_v39 = vpack.c.bf16 %v302_v38, %v300_v37  ;;  %v1699_v37 = vld [vmem:[#allocation9 + $0x10] sm:$0xff]  ;;  %v1698_v38 = vld [vmem:[#allocation9 + $0x8] sm:$0xff] }
  0xc8   :  { %423 = vmatmul.bf16.vlgmr.msra.gmra.mxu1 %v339_v39  ;;  %v1697_v39 = vld [vmem:[#allocation9] sm:$0xff] }
  0xc9   :  { %v326_v54 = vpop.f32.mrf.mxu2  ;;  %561 = vmatpush.bf16.msrb.mxu2 %v1699_v37 }
  0xca   :  { %v327_v56 = vadd.f32 %v326_v54, %v189_v53 }
  0xcb   :  { %v304_v40 = vpop.f32.mrf.mxu0 }
  0xcc   :  { %v305_v45 = vadd.f32 %v304_v40, %v180_v42  ;;  %v344_v59 = vpack.c.bf16 %v327_v56, %v325_v52 }
  0xcd   :  { %562 = vmatpush.bf16.msrb.mxu2 %v1698_v38 }
  0xce   :  { %448 = vmatmul.bf16.vlgmr.msra.gmra.mxu3 %v344_v59 }
  0xd1   :  { %v329_v0 = vpop.f32.mrf.mxu2  ;;  %563 = vmatpush.bf16.msrb.mxu2 %v1697_v39 }
  0xd2   :  { %v330_v7 = vadd.f32 %v329_v0, %v190_v2 }
  0xd3   :  { %v306_v44 = vpop.f32.mrf.mxu0 }
  0xd4   :  { %v307_v46 = vadd.f32 %v306_v44, %v181_v43 }
  0xd6   :  { %v340_v49 = vpack.c.bf16 %v307_v46, %v305_v45 }
  0xd8   :  { %428 = vmatmul.bf16.gmra.mxu1 %v340_v49 }
  0xd9   :  { %v331_v8 = vpop.f32.mrf.mxu2 }
  0xda   :  { %v332_v10 = vadd.f32 %v331_v8, %v191_v4 }
  0xdb   :  { %v309_v51 = vpop.f32.mrf.mxu0 }
  0xdc   :  { %v310_v61 = vadd.f32 %v309_v51, %v182_v57  ;;  %v345_v12 = vpack.c.bf16 %v332_v10, %v330_v7 }
  0xde   :  { %453 = vmatmul.bf16.gmra.mxu3 %v345_v12 }
  0xe1   :  { %v334_v20 = vpop.f32.mrf.mxu2 }
  0xe2   :  { %v335_v25 = vadd.f32 %v334_v20, %v192_v22 }
  0xe3   :  { %v311_v60 = vpop.f32.mrf.mxu0 }
  0xe4   :  { %v312_v62 = vadd.f32 %v311_v60, %v183_v58 }
  0xe6   :  { %v341_v1 = vpack.c.bf16 %v312_v62, %v310_v61 }
  0xe8   :  { %433 = vmatmul.bf16.gmra.mxu1 %v341_v1 }
  0xe9   :  { %v336_v26 = vpop.f32.mrf.mxu2 }
  0xea   :  { %v337_v28 = vadd.f32 %v336_v26, %v193_v23 }
  0xeb   :  { %v314_v6 = vpop.f32.mrf.mxu0 }
  0xec   :  { %v315_v17 = vadd.f32 %v314_v6, %v184_v13  ;;  %v346_v29 = vpack.c.bf16 %v337_v28, %v335_v25 }
  0xee   :  { %458 = vmatmul.bf16.gmra.mxu3 %v346_v29 }
  0xf3   :  { %v316_v16 = vpop.f32.mrf.mxu0 }
  0xf4   :  { %v317_v18 = vadd.f32 %v316_v16, %v185_v14 }
  0xf6   :  { %v342_v21 = vpack.c.bf16 %v317_v18, %v315_v17 }
  0xf8   :  { %438 = vmatmul.bf16.gmra.mxu1 %v342_v21 }
  0xfb   :  { %v319_v24 = vpop.f32.mrf.mxu0 }
  0xfc   :  { %v320_v33 = vadd.f32 %v319_v24, %v186_v30 }
 0x103   :  { %v321_v32 = vpop.f32.mrf.mxu0 }
 0x104   :  { %v322_v34 = vadd.f32 %v321_v32, %v187_v31 }
 0x106   :  { %v343_v35 = vpack.c.bf16 %v322_v34, %v320_v33  ;;  %v1874_v34 = vld [vmem:[%s2138_s5] ss:$0 sm:$0xff] }
 0x108   :  { %443 = vmatmul.bf16.gmra.mxu1 %v343_v35 }
 0x145   :  { %v424_v40 = vpop.f32.mrf.mxu1 }
 0x146   :  { %v425_v42 = vadd.f32 %v1873_v41, %v424_v40 }
 0x148   :  { %v464_v45 = vmax.f32 %v425_v42, 0.0 }
 0x14d   :  { %v426_v43 = vpop.f32.mrf.mxu1 }
 0x14e   :  { %v427_v44 = vadd.f32 %v1873_v41, %v426_v43 }
 0x150   :  { %v465_v46 = vmax.f32 %v427_v44, 0.0 }
 0x151   :  { %v449_v6 = vpop.f32.mrf.mxu3 }
 0x152   :  { %v480_v47 = vpack.c.bf16 %v465_v46, %v464_v45  ;;  %v450_v15 = vadd.f32 %v1873_v41, %v449_v6 }
 0x154   :  { %564 = vmatmul.bf16.vlgmr.msrb.gmra.mxu2 %v480_v47  ;;  %v474_v17 = vmax.f32 %v450_v15, 0.0 }
 0x155   :  { %v429_v48 = vpop.f32.mrf.mxu1 }
 0x156   :  { %v430_v49 = vadd.f32 %v1873_v41, %v429_v48 }
 0x158   :  { %v466_v52 = vmax.f32 %v430_v49, 0.0 }
 0x159   :  { %v451_v10 = vpop.f32.mrf.mxu3 }
 0x15a   :  { %v452_v16 = vadd.f32 %v1873_v41, %v451_v10 }
 0x15c   :  { %v475_v18 = vmax.f32 %v452_v16, 0.0 }
 0x15d   :  { %v431_v50 = vpop.f32.mrf.mxu1 }
 0x15e   :  { %v432_v51 = vadd.f32 %v1873_v41, %v431_v50  ;;  %v485_v19 = vpack.c.bf16 %v475_v18, %v474_v17 }
 0x160   :  { %v467_v53 = vmax.f32 %v432_v51, 0.0 }
 0x161   :  { %v454_v14 = vpop.f32.mrf.mxu3 }
 0x162   :  { %v481_v54 = vpack.c.bf16 %v467_v53, %v466_v52  ;;  %v455_v21 = vadd.f32 %v1873_v41, %v454_v14 }
 0x164   :  { %569 = vmatmul.bf16.gmra.mxu2 %v481_v54  ;;  %v476_v24 = vmax.f32 %v455_v21, 0.0 }
 0x165   :  { %v434_v55 = vpop.f32.mrf.mxu1 }
 0x166   :  { %v435_v56 = vadd.f32 %v1873_v41, %v434_v55 }
 0x168   :  { %v468_v59 = vmax.f32 %v435_v56, 0.0 }
 0x169   :  { %v456_v20 = vpop.f32.mrf.mxu3 }
 0x16a   :  { %v457_v22 = vadd.f32 %v1873_v41, %v456_v20 }
 0x16c   :  { %v477_v25 = vmax.f32 %v457_v22, 0.0 }
 0x16d   :  { %v436_v57 = vpop.f32.mrf.mxu1 }
 0x16e   :  { %v437_v58 = vadd.f32 %v1873_v41, %v436_v57  ;;  %v486_v26 = vpack.c.bf16 %v477_v25, %v476_v24 }
 0x170   :  { %v469_v60 = vmax.f32 %v437_v58, 0.0 }
 0x171   :  { %v459_v23 = vpop.f32.mrf.mxu3 }
 0x172   :  { %v482_v61 = vpack.c.bf16 %v469_v60, %v468_v59  ;;  %v460_v28 = vadd.f32 %v1873_v41, %v459_v23 }
 0x174   :  { %574 = vmatmul.bf16.gmra.mxu2 %v482_v61  ;;  %v478_v30 = vmax.f32 %v460_v28, 0.0 }
 0x175   :  { %v439_v62 = vpop.f32.mrf.mxu1 }
 0x176   :  { %v440_v63 = vadd.f32 %v1873_v41, %v439_v62 }
 0x178   :  { %v470_v2 = vmax.f32 %v440_v63, 0.0 }
 0x179   :  { %v461_v27 = vpop.f32.mrf.mxu3 }
 0x17a   :  { %v462_v29 = vadd.f32 %v1873_v41, %v461_v27 }
 0x17c   :  { %v479_v31 = vmax.f32 %v462_v29, 0.0 }
 0x17d   :  { %v441_v0 = vpop.f32.mrf.mxu1 }
 0x17e   :  { %v442_v1 = vadd.f32 %v1873_v41, %v441_v0  ;;  %v487_v32 = vpack.c.bf16 %v479_v31, %v478_v30 }
 0x180   :  { %v471_v3 = vmax.f32 %v442_v1, 0.0 }
 0x182   :  { %v483_v4 = vpack.c.bf16 %v471_v3, %v470_v2 }
 0x184   :  { %579 = vmatmul.bf16.gmra.mxu2 %v483_v4 }
 0x185   :  { %v444_v5 = vpop.f32.mrf.mxu1 }
 0x186   :  { %v445_v7 = vadd.f32 %v1873_v41, %v444_v5 }
 0x188   :  { %v472_v11 = vmax.f32 %v445_v7, 0.0 }
 0x18d   :  { %v446_v8 = vpop.f32.mrf.mxu1 }
 0x18e   :  { %v447_v9 = vadd.f32 %v1873_v41, %v446_v8 }
 0x190   :  { %v473_v12 = vmax.f32 %v447_v9, 0.0 }
 0x192   :  { %v484_v13 = vpack.c.bf16 %v473_v12, %v472_v11 }
 0x194   :  { %584 = vmatmul.bf16.gmra.mxu2 %v484_v13 }
 0x1a4   :  { %589 = vmatmul.bf16.gmra.mxu2 %v485_v19 }
 0x1b4   :  { %594 = vmatmul.bf16.gmra.mxu2 %v486_v26 }
 0x1c4   :  { %599 = vmatmul.bf16.gmra.mxu2 %v487_v32 }
 0x1d7   :  { %v565_v33 = vpop.f32.mrf.mxu2 }
 0x1d8   :  { %v566_v35 = vadd.f32 %v1874_v34, %v565_v33 }
 0x1da   :  { %v605_v38 = vmax.f32 %v566_v35, 0.0  ;;  %v1714_v35 = vld [vmem:[#allocation3 + $0x8] sm:$0xff] }
 0x1df   :  { %v567_v36 = vpop.f32.mrf.mxu2 }
 0x1e0   :  { %v568_v37 = vadd.f32 %v1874_v34, %v567_v36  ;;  %v1715_v36 = vld [vmem:[#allocation3 + $0x10] sm:$0xff] }
 0x1e2   :  { %v606_v39 = vmax.f32 %v568_v37, 0.0  ;;  %v1716_v37 = vld [vmem:[#allocation3 + $0x18] sm:$0xff] }
 0x1e4   :  { %v1756_v40 = vpack.c.bf16 %v606_v39, %v605_v38  ;;  %v1717_v38 = vld [vmem:[#allocation3 + $0x20] sm:$0xff]  ;;  %v1718_v39 = vld [vmem:[#allocation3 + $0x28] sm:$0xff] }
 0x1e6   :  { %1757 = vst [vmem:[#allocation2] sm:$0xff] %v1756_v40   ;;  %v1728_v40 = vld [vmem:[#allocation8 + $0x78] sm:$0xff] }
 0x1e7   :  { %v570_v42 = vpop.f32.mrf.mxu2  ;;  %924 = vmatpush.bf16.msrb.mxu0 %v1728_v40 }
 0x1e8   :  { %v571_v43 = vadd.f32 %v1874_v34, %v570_v42  ;;  %v1727_v42 = vld [vmem:[#allocation8 + $0x70] sm:$0xff] }
 0x1ea   :  { %v607_v45 = vmax.f32 %v571_v43, 0.0  ;;  %v1726_v43 = vld [vmem:[#allocation8 + $0x68] sm:$0xff] }
 0x1eb   :  { %925 = vmatpush.bf16.msrb.mxu0 %v1727_v42 }
 0x1ed   :  { %v1705_v33 = vld [vmem:[#allocation2] sm:$0xff] }
 0x1ef   :  { %v572_v44 = vpop.f32.mrf.mxu2  ;;  %926 = vmatpush.bf16.msrb.mxu0 %v1726_v43 }
 0x1f0   :  { %v573_v41 = vadd.f32 %v1874_v34, %v572_v44  ;;  %v1725_v44 = vld [vmem:[#allocation8 + $0x60] sm:$0xff] }
 0x1f2   :  { %v608_v46 = vmax.f32 %v573_v41, 0.0  ;;  %v1719_v41 = vld [vmem:[#allocation3 + $0x30] sm:$0xff] }
 0x1f3   :  { %927 = vmatpush.bf16.msrb.mxu0 %v1725_v44  ;;  %v1732_v44 = vld [vmem:[#allocation9 + $0x58] sm:$0xff] }
 0x1f4   :  { %v1761_v47 = vpack.c.bf16 %v608_v46, %v607_v45  ;;  %v1724_v45 = vld [vmem:[#allocation8 + $0x58] sm:$0xff]  ;;  %v1723_v46 = vld [vmem:[#allocation8 + $0x50] sm:$0xff] }
 0x1f6   :  { %1833 = vst [vmem:[#allocation2 + $0x8] sm:$0xff] %v1761_v47   ;;  %v1722_v47 = vld [vmem:[#allocation8 + $0x48] sm:$0xff] }
 0x1f7   :  { %v575_v48 = vpop.f32.mrf.mxu2  ;;  %928 = vmatpush.bf16.msrb.mxu0 %v1724_v45 }
 0x1f8   :  { %v576_v49 = vadd.f32 %v1874_v34, %v575_v48  ;;  %v1721_v48 = vld [vmem:[#allocation8 + $0x40] sm:$0xff] }
 0x1fa   :  { %v609_v52 = vmax.f32 %v576_v49, 0.0  ;;  %v1720_v49 = vld [vmem:[#allocation3 + $0x38] sm:$0xff] }
 0x1fb   :  { %929 = vmatpush.bf16.msrb.mxu0 %v1723_v46 }
 0x1fd   :  { %v1706_v32 = vld [vmem:[#allocation2 + $0x8] sm:$0xff] }
 0x1ff   :  { %v577_v50 = vpop.f32.mrf.mxu2  ;;  %930 = vmatpush.bf16.msrb.mxu0 %v1722_v47  ;;  %v1731_v47 = vld [vmem:[#allocation9 + $0x50] sm:$0xff] }
 0x200   :  { %v578_v51 = vadd.f32 %v1874_v34, %v577_v50 }
 0x202   :  { %v610_v53 = vmax.f32 %v578_v51, 0.0  ;;  %v653_v51 = vld [vmem:[#allocation2] sm:$0xff]  }
 0x203   :  { %931 = vmatpush.bf16.msrb.mxu0 %v1721_v48 }
 0x204   :  { %v1766_v54 = vpack.c.bf16 %v610_v53, %v609_v52  ;;  %v685_v52 = vunpack.c.l.bf16 %v653_v51  ;;  %v686_v53 = vunpack.c.h.bf16 %v653_v51  ;;  %v1729_v51 = vld [vmem:[#allocation9 + $0x40] sm:$0xff] }
 0x206   :  { %1834 = vst [vmem:[#allocation2 + $0x10] sm:$0xff] %v1766_v54  }
 0x207   :  { %v580_v55 = vpop.f32.mrf.mxu2 }
 0x208   :  { %v581_v56 = vadd.f32 %v1874_v34, %v580_v55 }
 0x20a   :  { %v611_v59 = vmax.f32 %v581_v56, 0.0 }
 0x20d   :  { %v1707_v31 = vld [vmem:[#allocation2 + $0x10] sm:$0xff] }
 0x20f   :  { %v582_v57 = vpop.f32.mrf.mxu2 }
 0x210   :  { %v583_v58 = vadd.f32 %v1874_v34, %v582_v57 }
 0x212   :  { %v612_v60 = vmax.f32 %v583_v58, 0.0 }
 0x214   :  { %v1771_v61 = vpack.c.bf16 %v612_v60, %v611_v59  ;;  %v655_v59 = vld [vmem:[#allocation2 + $0x8] sm:$0xff]  }
 0x215   :  { %v687_v60 = vunpack.c.l.bf16 %v655_v59 }
 0x216   :  { %1835 = vst [vmem:[#allocation2 + $0x18] sm:$0xff] %v1771_v61   ;;  %v688_v61 = vunpack.c.h.bf16 %v655_v59  ;;  %v1875_v59 = vld [vmem:[%s2136_s3 + $0x1] ss:$0 sm:$0xff] }
 0x217   :  { %v585_v62 = vpop.f32.mrf.mxu2 }
 0x218   :  { %v586_v63 = vadd.f32 %v1874_v34, %v585_v62 }
 0x21a   :  { %v613_v2 = vmax.f32 %v586_v63, 0.0 }
 0x21d   :  { %v1708_v30 = vld [vmem:[#allocation2 + $0x18] sm:$0xff] }
 0x21f   :  { %v587_v0 = vpop.f32.mrf.mxu2 }
 0x220   :  { %v588_v1 = vadd.f32 %v1874_v34, %v587_v0 }
 0x222   :  { %v614_v3 = vmax.f32 %v588_v1, 0.0 }
 0x224   :  { %v1776_v4 = vpack.c.bf16 %v614_v3, %v613_v2  ;;  %v657_v3 = vld [vmem:[#allocation2 + $0x10] sm:$0xff]  }
 0x226   :  { %1836 = vst [vmem:[#allocation2 + $0x20] sm:$0xff] %v1776_v4   ;;  %v689_v4 = vunpack.c.l.bf16 %v657_v3 }
 0x227   :  { %v590_v5 = vpop.f32.mrf.mxu2 }
 0x228   :  { %v591_v6 = vadd.f32 %v1874_v34, %v590_v5  ;;  %v690_v5 = vunpack.c.h.bf16 %v657_v3 }
 0x22a   :  { %v615_v9 = vmax.f32 %v591_v6, 0.0 }
 0x22d   :  { %v1709_v29 = vld [vmem:[#allocation2 + $0x20] sm:$0xff] }
 0x22f   :  { %v592_v7 = vpop.f32.mrf.mxu2 }
 0x230   :  { %v593_v8 = vadd.f32 %v1874_v34, %v592_v7 }
 0x232   :  { %v616_v10 = vmax.f32 %v593_v8, 0.0 }
 0x234   :  { %v1781_v11 = vpack.c.bf16 %v616_v10, %v615_v9 }
 0x236   :  { %1837 = vst [vmem:[#allocation2 + $0x28] sm:$0xff] %v1781_v11   ;;  %v659_v11 = vld [vmem:[#allocation2 + $0x18] sm:$0xff]  }
 0x237   :  { %v595_v12 = vpop.f32.mrf.mxu2 }
 0x238   :  { %v596_v13 = vadd.f32 %v1874_v34, %v595_v12  ;;  %v691_v12 = vunpack.c.l.bf16 %v659_v11 }
 0x23a   :  { %v617_v16 = vmax.f32 %v596_v13, 0.0  ;;  %v692_v13 = vunpack.c.h.bf16 %v659_v11 }
 0x23d   :  { %v1710_v28 = vld [vmem:[#allocation2 + $0x28] sm:$0xff] }
 0x23f   :  { %v597_v14 = vpop.f32.mrf.mxu2 }
 0x240   :  { %v598_v15 = vadd.f32 %v1874_v34, %v597_v14 }
 0x242   :  { %v618_v17 = vmax.f32 %v598_v15, 0.0 }
 0x244   :  { %v1786_v18 = vpack.c.bf16 %v618_v17, %v617_v16 }
 0x246   :  { %1838 = vst [vmem:[#allocation2 + $0x30] sm:$0xff] %v1786_v18  }
 0x247   :  { %v600_v19 = vpop.f32.mrf.mxu2 }
 0x248   :  { %v601_v20 = vadd.f32 %v1874_v34, %v600_v19  ;;  %v661_v19 = vld [vmem:[#allocation2 + $0x20] sm:$0xff]  }
 0x24a   :  { %v619_v23 = vmax.f32 %v601_v20, 0.0  ;;  %v693_v20 = vunpack.c.l.bf16 %v661_v19 }
 0x24d   :  { %v1711_v27 = vld [vmem:[#allocation2 + $0x30] sm:$0xff] }
 0x24f   :  { %v602_v21 = vpop.f32.mrf.mxu2 }
 0x250   :  { %v603_v22 = vadd.f32 %v1874_v34, %v602_v21  ;;  %v1713_v34 = vld [vmem:[#allocation3] sm:$0xff]  ;;  %v694_v21 = vunpack.c.h.bf16 %v661_v19 }
 0x252   :  { %v620_v24 = vmax.f32 %v603_v22, 0.0 }
 0x254   :  { %v1791_v25 = vpack.c.bf16 %v620_v24, %v619_v23 }
 0x256   :  { %1839 = vst [vmem:[#allocation2 + $0x38] sm:$0xff] %v1791_v25  }
 0x25d   :  { %v1712_v26 = vld [vmem:[#allocation2 + $0x38] sm:$0xff] }
 0x25e   :  { %797 = vmatpush.bf16.msrb.mxu3 %v1712_v26 }
 0x262   :  { %798 = vmatpush.bf16.msrb.mxu3 %v1711_v27  ;;  %v663_v27 = vld [vmem:[#allocation2 + $0x28] sm:$0xff]  }
 0x266   :  { %799 = vmatpush.bf16.msrb.mxu3 %v1710_v28  ;;  %v695_v28 = vunpack.c.l.bf16 %v663_v27 }
 0x26a   :  { %800 = vmatpush.bf16.msrb.mxu3 %v1709_v29  ;;  %v696_v29 = vunpack.c.h.bf16 %v663_v27 }
 0x26e   :  { %801 = vmatpush.bf16.msrb.mxu3 %v1708_v30 }
 0x272   :  { %802 = vmatpush.bf16.msrb.mxu3 %v1707_v31  ;;  %v1736_v31 = vld [vmem:[#allocation9 + $0x78] sm:$0xff] }
 0x273   :  { %1067 = vmatpush.bf16.msrb.mxu1 %v1736_v31 }
 0x276   :  { %803 = vmatpush.bf16.msrb.mxu3 %v1706_v32 }
 0x27a   :  { %804 = vmatpush.bf16.msrb.mxu3 %v1705_v33 }
 0x27d   :  { %805 = vmatmul.bf16.vlgmr.msrb.gmra.mxu3 %v1713_v34 }
 0x28d   :  { %810 = vmatmul.bf16.gmra.mxu3 %v1714_v35  ;;  %v1735_v35 = vld [vmem:[#allocation9 + $0x70] sm:$0xff] }
 0x28e   :  { %1068 = vmatpush.bf16.msrb.mxu1 %v1735_v35 }
 0x29d   :  { %815 = vmatmul.bf16.gmra.mxu3 %v1715_v36  ;;  %v1734_v36 = vld [vmem:[#allocation9 + $0x68] sm:$0xff] }
 0x29e   :  { %1069 = vmatpush.bf16.msrb.mxu1 %v1734_v36 }
 0x2ad   :  { %820 = vmatmul.bf16.gmra.mxu3 %v1716_v37 }
 0x2bd   :  { %825 = vmatmul.bf16.gmra.mxu3 %v1717_v38  ;;  %v1733_v38 = vld [vmem:[#allocation9 + $0x60] sm:$0xff] }
 0x2be   :  { %1070 = vmatpush.bf16.msrb.mxu1 %v1733_v38 }
 0x2c2   :  { %1071 = vmatpush.bf16.msrb.mxu1 %v1732_v44 }
 0x2c6   :  { %1072 = vmatpush.bf16.msrb.mxu1 %v1731_v47 }
 0x2cd   :  { %830 = vmatmul.bf16.gmra.mxu3 %v1718_v39  ;;  %v665_v39 = vld [vmem:[#allocation2 + $0x30] sm:$0xff]  }
 0x2ce   :  { %v697_v40 = vunpack.c.l.bf16 %v665_v39  ;;  %v698_v42 = vunpack.c.h.bf16 %v665_v39 }
 0x2dd   :  { %835 = vmatmul.bf16.gmra.mxu3 %v1719_v41 }
 0x2ed   :  { %840 = vmatmul.bf16.gmra.mxu3 %v1720_v49  ;;  %v1730_v49 = vld [vmem:[#allocation9 + $0x48] sm:$0xff] }
 0x2ee   :  { %1073 = vmatpush.bf16.msrb.mxu1 %v1730_v49 }
 0x2f2   :  { %1074 = vmatpush.bf16.msrb.mxu1 %v1729_v51 }
 0x300   :  { %v806_v50 = vpop.f32.mrf.mxu3 }
 0x301   :  { %v807_v55 = vadd.f32 %v806_v50, %v685_v52  ;;  %v667_v50 = vld [vmem:[#allocation2 + $0x38] sm:$0xff]  }
 0x302   :  { %v699_v52 = vunpack.c.l.bf16 %v667_v50 }
 0x308   :  { %v808_v54 = vpop.f32.mrf.mxu3 }
 0x309   :  { %v809_v56 = vadd.f32 %v808_v54, %v686_v53  ;;  %v700_v53 = vunpack.c.h.bf16 %v667_v50 }
 0x30b   :  { %v846_v57 = vpack.c.bf16 %v809_v56, %v807_v55 }
 0x30d   :  { %932 = vmatmul.bf16.vlgmr.msrb.gmra.mxu0 %v846_v57 }
 0x310   :  { %v811_v58 = vpop.f32.mrf.mxu3 }
 0x311   :  { %v812_v63 = vadd.f32 %v811_v58, %v687_v60 }
 0x318   :  { %v813_v62 = vpop.f32.mrf.mxu3 }
 0x319   :  { %v814_v0 = vadd.f32 %v813_v62, %v688_v61 }
 0x31b   :  { %v847_v1 = vpack.c.bf16 %v814_v0, %v812_v63 }
 0x31d   :  { %937 = vmatmul.bf16.gmra.mxu0 %v847_v1 }
 0x320   :  { %v816_v2 = vpop.f32.mrf.mxu3 }
 0x321   :  { %v817_v7 = vadd.f32 %v816_v2, %v689_v4 }
 0x328   :  { %v818_v6 = vpop.f32.mrf.mxu3 }
 0x329   :  { %v819_v8 = vadd.f32 %v818_v6, %v690_v5 }
 0x32b   :  { %v848_v9 = vpack.c.bf16 %v819_v8, %v817_v7 }
 0x32d   :  { %942 = vmatmul.bf16.gmra.mxu0 %v848_v9 }
 0x330   :  { %v821_v10 = vpop.f32.mrf.mxu3 }
 0x331   :  { %v822_v15 = vadd.f32 %v821_v10, %v691_v12 }
 0x338   :  { %v823_v14 = vpop.f32.mrf.mxu3 }
 0x339   :  { %v824_v16 = vadd.f32 %v823_v14, %v692_v13 }
 0x33b   :  { %v849_v17 = vpack.c.bf16 %v824_v16, %v822_v15 }
 0x33d   :  { %947 = vmatmul.bf16.gmra.mxu0 %v849_v17 }
 0x340   :  { %v826_v18 = vpop.f32.mrf.mxu3 }
 0x341   :  { %v827_v23 = vadd.f32 %v826_v18, %v693_v20 }
 0x348   :  { %v828_v22 = vpop.f32.mrf.mxu3 }
 0x349   :  { %v829_v24 = vadd.f32 %v828_v22, %v694_v21 }
 0x34b   :  { %v850_v25 = vpack.c.bf16 %v829_v24, %v827_v23 }
 0x34d   :  { %952 = vmatmul.bf16.gmra.mxu0 %v850_v25 }
 0x350   :  { %v831_v26 = vpop.f32.mrf.mxu3 }
 0x351   :  { %v832_v32 = vadd.f32 %v831_v26, %v695_v28 }
 0x358   :  { %v833_v30 = vpop.f32.mrf.mxu3 }
 0x359   :  { %v834_v33 = vadd.f32 %v833_v30, %v696_v29 }
 0x35b   :  { %v851_v34 = vpack.c.bf16 %v834_v33, %v832_v32 }
 0x35d   :  { %957 = vmatmul.bf16.gmra.mxu0 %v851_v34 }
 0x360   :  { %v836_v37 = vpop.f32.mrf.mxu3 }
 0x361   :  { %v837_v41 = vadd.f32 %v836_v37, %v697_v40 }
 0x368   :  { %v838_v43 = vpop.f32.mrf.mxu3 }
 0x369   :  { %v839_v45 = vadd.f32 %v838_v43, %v698_v42 }
 0x36b   :  { %v852_v46 = vpack.c.bf16 %v839_v45, %v837_v41 }
 0x36d   :  { %962 = vmatmul.bf16.gmra.mxu0 %v852_v46 }
 0x370   :  { %v841_v48 = vpop.f32.mrf.mxu3 }
 0x371   :  { %v842_v55 = vadd.f32 %v841_v48, %v699_v52  ;;  %v1876_v52 = vld [vmem:[%s2138_s5 + $0x1] ss:$0 sm:$0xff] }
 0x378   :  { %v843_v54 = vpop.f32.mrf.mxu3 }
 0x379   :  { %v844_v56 = vadd.f32 %v843_v54, %v700_v53 }
 0x37b   :  { %v853_v57 = vpack.c.bf16 %v844_v56, %v842_v55 }
 0x37d   :  { %967 = vmatmul.bf16.gmra.mxu0 %v853_v57 }
 0x38a   :  { %v933_v58 = vpop.f32.mrf.mxu0 }
 0x38b   :  { %v934_v60 = vadd.f32 %v1875_v59, %v933_v58 }
 0x38d   :  { %v973_v63 = vmax.f32 %v934_v60, 0.0 }
 0x392   :  { %v935_v61 = vpop.f32.mrf.mxu0 }
 0x393   :  { %v936_v62 = vadd.f32 %v1875_v59, %v935_v61 }
 0x395   :  { %v974_v0 = vmax.f32 %v936_v62, 0.0 }
 0x397   :  { %v989_v1 = vpack.c.bf16 %v974_v0, %v973_v63 }
 0x399   :  { %1075 = vmatmul.bf16.vlgmr.msrb.gmra.mxu1 %v989_v1 }
 0x39a   :  { %v938_v2 = vpop.f32.mrf.mxu0 }
 0x39b   :  { %v939_v3 = vadd.f32 %v1875_v59, %v938_v2 }
 0x39d   :  { %v975_v6 = vmax.f32 %v939_v3, 0.0 }
 0x3a2   :  { %v940_v4 = vpop.f32.mrf.mxu0 }
 0x3a3   :  { %v941_v5 = vadd.f32 %v1875_v59, %v940_v4 }
 0x3a5   :  { %v976_v7 = vmax.f32 %v941_v5, 0.0 }
 0x3a7   :  { %v990_v8 = vpack.c.bf16 %v976_v7, %v975_v6 }
 0x3a9   :  { %1080 = vmatmul.bf16.gmra.mxu1 %v990_v8 }
 0x3aa   :  { %v943_v9 = vpop.f32.mrf.mxu0 }
 0x3ab   :  { %v944_v10 = vadd.f32 %v1875_v59, %v943_v9 }
 0x3ad   :  { %v977_v13 = vmax.f32 %v944_v10, 0.0 }
 0x3b2   :  { %v945_v11 = vpop.f32.mrf.mxu0 }
 0x3b3   :  { %v946_v12 = vadd.f32 %v1875_v59, %v945_v11 }
 0x3b5   :  { %v978_v14 = vmax.f32 %v946_v12, 0.0 }
 0x3b7   :  { %v991_v15 = vpack.c.bf16 %v978_v14, %v977_v13 }
 0x3b9   :  { %1085 = vmatmul.bf16.gmra.mxu1 %v991_v15 }
 0x3ba   :  { %v948_v16 = vpop.f32.mrf.mxu0 }
 0x3bb   :  { %v949_v17 = vadd.f32 %v1875_v59, %v948_v16 }
 0x3bd   :  { %v979_v20 = vmax.f32 %v949_v17, 0.0 }
 0x3c2   :  { %v950_v18 = vpop.f32.mrf.mxu0 }
 0x3c3   :  { %v951_v19 = vadd.f32 %v1875_v59, %v950_v18 }
 0x3c5   :  { %v980_v21 = vmax.f32 %v951_v19, 0.0 }
 0x3c7   :  { %v992_v22 = vpack.c.bf16 %v980_v21, %v979_v20 }
 0x3c9   :  { %1090 = vmatmul.bf16.gmra.mxu1 %v992_v22 }
 0x3ca   :  { %v953_v23 = vpop.f32.mrf.mxu0 }
 0x3cb   :  { %v954_v24 = vadd.f32 %v1875_v59, %v953_v23 }
 0x3cd   :  { %v981_v27 = vmax.f32 %v954_v24, 0.0 }
 0x3d2   :  { %v955_v25 = vpop.f32.mrf.mxu0 }
 0x3d3   :  { %v956_v26 = vadd.f32 %v1875_v59, %v955_v25 }
 0x3d5   :  { %v982_v28 = vmax.f32 %v956_v26, 0.0 }
 0x3d7   :  { %v993_v29 = vpack.c.bf16 %v982_v28, %v981_v27 }
 0x3d9   :  { %1095 = vmatmul.bf16.gmra.mxu1 %v993_v29 }
 0x3da   :  { %v958_v30 = vpop.f32.mrf.mxu0 }
 0x3db   :  { %v959_v31 = vadd.f32 %v1875_v59, %v958_v30 }
 0x3dd   :  { %v983_v34 = vmax.f32 %v959_v31, 0.0 }
 0x3e2   :  { %v960_v32 = vpop.f32.mrf.mxu0 }
 0x3e3   :  { %v961_v33 = vadd.f32 %v1875_v59, %v960_v32 }
 0x3e5   :  { %v984_v35 = vmax.f32 %v961_v33, 0.0 }
 0x3e7   :  { %v994_v36 = vpack.c.bf16 %v984_v35, %v983_v34 }
 0x3e9   :  { %1100 = vmatmul.bf16.gmra.mxu1 %v994_v36 }
 0x3ea   :  { %v963_v37 = vpop.f32.mrf.mxu0 }
 0x3eb   :  { %v964_v38 = vadd.f32 %v1875_v59, %v963_v37 }
 0x3ed   :  { %v985_v42 = vmax.f32 %v964_v38, 0.0 }
 0x3f2   :  { %v965_v39 = vpop.f32.mrf.mxu0 }
 0x3f3   :  { %v966_v40 = vadd.f32 %v1875_v59, %v965_v39 }
 0x3f5   :  { %v986_v43 = vmax.f32 %v966_v40, 0.0 }
 0x3f7   :  { %v995_v44 = vpack.c.bf16 %v986_v43, %v985_v42 }
 0x3f9   :  { %1105 = vmatmul.bf16.gmra.mxu1 %v995_v44 }
 0x3fa   :  { %v968_v41 = vpop.f32.mrf.mxu0 }
 0x3fb   :  { %v969_v45 = vadd.f32 %v1875_v59, %v968_v41 }
 0x3fd   :  { %v987_v48 = vmax.f32 %v969_v45, 0.0  ;;  %v1752_v45 = vld [vmem:[#allocation11 + $0x38] sm:$0xff] }
 0x3fe   :  { %1318 = vmatpush.bf16.msra.mxu3 %v1752_v45 }
 0x402   :  { %v970_v46 = vpop.f32.mrf.mxu0 }
 0x403   :  { %v971_v47 = vadd.f32 %v1875_v59, %v970_v46  ;;  %v1242_v46 = vld [vmem:[%s2142_s9] sm:$0xff] }
 0x405   :  { %v988_v49 = vmax.f32 %v971_v47, 0.0  ;;  %v2037_v47 = vmov 0  }
 0x406   :  { %1872 = vset.pattern.permute.xlu0 %v2037_v47 }
 0x407   :  { %v996_v50 = vpack.c.bf16 %v988_v49, %v987_v48  ;;  %1245 = vperm.xlu0 %1872, %v1242_v46   ;;  %v1751_v48 = vld [vmem:[#allocation11 + $0x30] sm:$0xff] }
 0x408   :  { %1319 = vmatpush.bf16.msra.mxu3 %v1751_v48 }
 0x409   :  { %1110 = vmatmul.bf16.gmra.mxu1 %v996_v50  ;;  %v1750_v50 = vld [vmem:[#allocation11 + $0x28] sm:$0xff] }
 0x40c   :  { %1320 = vmatpush.bf16.msra.mxu3 %v1750_v50 }
 0x416   :  { %v1076_v51 = vpop.f32.mrf.mxu1 }
 0x417   :  { %v1077_v53 = vadd.f32 %v1876_v52, %v1076_v51 }
 0x419   :  { %v1116_v56 = vmax.f32 %v1077_v53, 0.0 }
 0x41e   :  { %v1078_v54 = vpop.f32.mrf.mxu1 }
 0x41f   :  { %v1079_v55 = vadd.f32 %v1876_v52, %v1078_v54  ;;  %v1748_v54 = vld [vmem:[#allocation11 + $0x18] sm:$0xff] }
 0x421   :  { %v1117_v57 = vmax.f32 %v1079_v55, 0.0 }
 0x423   :  { %v1796_v58 = vpack.c.bf16 %v1117_v57, %v1116_v56  ;;  %v1747_v56 = vld [vmem:[#allocation11 + $0x10] sm:$0xff] }
 0x425   :  { %1797 = vst [vmem:[#allocation2] sm:$0xff] %v1796_v58   ;;  %v1746_v58 = vld [vmem:[#allocation11 + $0x8] sm:$0xff] }
 0x426   :  { %v1081_v60 = vpop.f32.mrf.mxu1 }
 0x427   :  { %v1082_v61 = vadd.f32 %v1876_v52, %v1081_v60 }
 0x429   :  { %v1118_v63 = vmax.f32 %v1082_v61, 0.0  ;;  %v1745_v61 = vld [vmem:[#allocation11] sm:$0xff] }
 0x42e   :  { %v1083_v62 = vpop.f32.mrf.mxu1 }
 0x42f   :  { %v1084_v59 = vadd.f32 %v1876_v52, %v1083_v62  ;;  %v1737_v62 = vld [vmem:[#allocation2] sm:$0xff] }
 0x431   :  { %v1119_v0 = vmax.f32 %v1084_v59, 0.0  ;;  %v1164_v59 = vld [vmem:[%s2141_s8] sm:$0xf] }
 0x433   :  { %v1801_v1 = vpack.c.bf16 %v1119_v0, %v1118_v63 }
 0x435   :  { %1840 = vst [vmem:[#allocation2 + $0x8] sm:$0xff] %v1801_v1  }
 0x436   :  { %v1086_v2 = vpop.f32.mrf.mxu1 }
 0x437   :  { %v1087_v3 = vadd.f32 %v1876_v52, %v1086_v2 }
 0x439   :  { %v1120_v6 = vmax.f32 %v1087_v3, 0.0 }
 0x43c   :  { %v1738_v60 = vld [vmem:[#allocation2 + $0x8] sm:$0xff] }
 0x43e   :  { %v1088_v4 = vpop.f32.mrf.mxu1 }
 0x43f   :  { %v1089_v5 = vadd.f32 %v1876_v52, %v1088_v4  ;;  %v1877_v4 = vld [vmem:[%s2140_s7] ss:$0 sm:$0xff] }
 0x441   :  { %v1121_v7 = vmax.f32 %v1089_v5, 0.0 }
 0x443   :  { %v1806_v8 = vpack.c.bf16 %v1121_v7, %v1120_v6 }
 0x445   :  { %1841 = vst [vmem:[#allocation2 + $0x10] sm:$0xff] %v1806_v8  }
 0x446   :  { %v1091_v9 = vpop.f32.mrf.mxu1 }
 0x447   :  { %v1092_v10 = vadd.f32 %v1876_v52, %v1091_v9 }
 0x449   :  { %v1122_v13 = vmax.f32 %v1092_v10, 0.0 }
 0x44c   :  { %v1739_v57 = vld [vmem:[#allocation2 + $0x10] sm:$0xff] }
 0x44e   :  { %v1093_v11 = vpop.f32.mrf.mxu1 }
 0x44f   :  { %v1094_v12 = vadd.f32 %v1876_v52, %v1093_v11 }
 0x451   :  { %v1123_v14 = vmax.f32 %v1094_v12, 0.0 }
 0x453   :  { %v1811_v15 = vpack.c.bf16 %v1123_v14, %v1122_v13 }
 0x455   :  { %1842 = vst [vmem:[#allocation2 + $0x18] sm:$0xff] %v1811_v15  }
 0x456   :  { %v1096_v16 = vpop.f32.mrf.mxu1 }
 0x457   :  { %v1097_v17 = vadd.f32 %v1876_v52, %v1096_v16 }
 0x459   :  { %v1124_v20 = vmax.f32 %v1097_v17, 0.0 }
 0x45c   :  { %v1740_v55 = vld [vmem:[#allocation2 + $0x18] sm:$0xff] }
 0x45e   :  { %v1098_v18 = vpop.f32.mrf.mxu1 }
 0x45f   :  { %v1099_v19 = vadd.f32 %v1876_v52, %v1098_v18 }
 0x461   :  { %v1125_v21 = vmax.f32 %v1099_v19, 0.0 }
 0x463   :  { %v1816_v22 = vpack.c.bf16 %v1125_v21, %v1124_v20 }
 0x465   :  { %1843 = vst [vmem:[#allocation2 + $0x20] sm:$0xff] %v1816_v22  }
 0x466   :  { %v1101_v23 = vpop.f32.mrf.mxu1 }
 0x467   :  { %v1102_v24 = vadd.f32 %v1876_v52, %v1101_v23 }
 0x469   :  { %v1126_v27 = vmax.f32 %v1102_v24, 0.0 }
 0x46c   :  { %v1741_v53 = vld [vmem:[#allocation2 + $0x20] sm:$0xff] }
 0x46e   :  { %v1103_v25 = vpop.f32.mrf.mxu1 }
 0x46f   :  { %v1104_v26 = vadd.f32 %v1876_v52, %v1103_v25 }
 0x471   :  { %v1127_v28 = vmax.f32 %v1104_v26, 0.0 }
 0x473   :  { %v1821_v29 = vpack.c.bf16 %v1127_v28, %v1126_v27 }
 0x475   :  { %1844 = vst [vmem:[#allocation2 + $0x28] sm:$0xff] %v1821_v29  }
 0x476   :  { %v1106_v30 = vpop.f32.mrf.mxu1 }
 0x477   :  { %v1107_v31 = vadd.f32 %v1876_v52, %v1106_v30 }
 0x479   :  { %v1128_v34 = vmax.f32 %v1107_v31, 0.0  ;;  %v1246_v63 = vpop.permute.xlu0 %1245 }
 0x47c   :  { %v1742_v51 = vld [vmem:[#allocation2 + $0x28] sm:$0xff] }
 0x47e   :  { %v1108_v32 = vpop.f32.mrf.mxu1 }
 0x47f   :  { %v1109_v33 = vadd.f32 %v1876_v52, %v1108_v32 }
 0x481   :  { %v1129_v35 = vmax.f32 %v1109_v33, 0.0 }
 0x483   :  { %v1826_v36 = vpack.c.bf16 %v1129_v35, %v1128_v34 }
 0x485   :  { %1845 = vst [vmem:[#allocation2 + $0x30] sm:$0xff] %v1826_v36  }
 0x486   :  { %v1111_v37 = vpop.f32.mrf.mxu1 }
 0x487   :  { %v1112_v38 = vadd.f32 %v1876_v52, %v1111_v37 }
 0x489   :  { %v1130_v42 = vmax.f32 %v1112_v38, 0.0 }
 0x48c   :  { %v1743_v49 = vld [vmem:[#allocation2 + $0x30] sm:$0xff] }
 0x48e   :  { %v1113_v39 = vpop.f32.mrf.mxu1 }
 0x48f   :  { %v1114_v40 = vadd.f32 %v1876_v52, %v1113_v39  ;;  %v1749_v52 = vld [vmem:[#allocation11 + $0x20] sm:$0xff] }
 0x490   :  { %1321 = vmatpush.bf16.msra.mxu3 %v1749_v52 }
 0x491   :  { %v1131_v43 = vmax.f32 %v1114_v40, 0.0 }
 0x493   :  { %v1831_v44 = vpack.c.bf16 %v1131_v43, %v1130_v42 }
 0x494   :  { %1322 = vmatpush.bf16.msra.mxu3 %v1748_v54 }
 0x495   :  { %1846 = vst [vmem:[#allocation2 + $0x38] sm:$0xff] %v1831_v44  }
 0x498   :  { %1323 = vmatpush.bf16.msra.mxu3 %v1747_v56 }
 0x49c   :  { %v1744_v41 = vld [vmem:[#allocation2 + $0x38] sm:$0xff]  ;;  %1324 = vmatpush.bf16.msra.mxu3 %v1746_v58 }
 0x49d   :  { %1229 = vmatpush.bf16.msra.mxu2 %v1744_v41 }
 0x4a0   :  { %1325 = vmatpush.bf16.msra.mxu3 %v1745_v61 }
 0x4a1   :  { %1230 = vmatpush.bf16.msra.mxu2 %v1743_v49 }
 0x4a5   :  { %1231 = vmatpush.bf16.msra.mxu2 %v1742_v51 }
 0x4a9   :  { %1232 = vmatpush.bf16.msra.mxu2 %v1741_v53 }
 0x4ad   :  { %1233 = vmatpush.bf16.msra.mxu2 %v1740_v55 }
 0x4b1   :  { %1234 = vmatpush.bf16.msra.mxu2 %v1739_v57 }
 0x4b5   :  { %1235 = vmatpush.bf16.msra.mxu2 %v1738_v60 }
 0x4b9   :  { %1236 = vmatpush.bf16.msra.mxu2 %v1737_v62 }
 0x4bc   :  { %1237 = vmatmul.bf16.vlgmr.msra.gmra.mxu2 %v1164_v59 }
 0x53f   :  { %v1238_v0 = vpop.f32.mrf.mxu2 }
 0x540   :  { %v1248_v1 = vmul.f32 %v1246_v63, %v1238_v0 }
 0x542   :  { %v1249_v2 = vpack.c.bf16 %v1248_v1, %v1248_v1 }
 0x544   :  { %1326 = vmatmul.bf16.vlgmr.msra.gmra.mxu3 %v1249_v2 }
 0x547   :  { %v1240_v3 = vpop.f32.mrf.mxu2 }
 0x5c7   :  { %v1327_v5 = vpop.f32.mrf.mxu3 }
 0x5c8   :  { %v1328_v6 = vadd.f32 %v1877_v4, %v1327_v5 }
 0x5ca   :  { %1331 = vst [vmem:[#allocation12] sm:$0xff] %v1328_v6 }
 0x5cb   :  { %1342 = dma.vmem_to_hbm [thread:$0]  %s1338_s27, 128, %s1340_s29, [#allocation5]  }
 0x5cf   :  { %v1329_v7 = vpop.f32.mrf.mxu3 }
 0x5d0   :  { %2028 = dma.done.wait [#allocation5], 128  }
 0x5d1   :  { %2029 = vsyncadd [#allocation5], 4294967168 }
 0x5d2   :  { %1347 = vsyncpa [#allocation4], 1 }
 0x5d3   :  { %1348 = vsyncpa [#allocation7], 1 }
 0x5d4   :  { %1349 = vsyncpa [#allocation10], 1 }
 0x5d5   :  { %1350 = vsyncpa [#allocation5], 1 }

</bundles_post_ra>
